<compile_context>
chip_gen: v7x
topology: tpu7x:2x2x1
jax: 0.10.0
libtpu: 0.0.40
codegen_flags: <defaults>
</compile_context>

<pallas_src>
import functools

import jax
import jax.numpy as jnp
from jax.experimental import pallas as pl
from jax.experimental.pallas import tpu as pltpu

HIDDEN = 12   # hidden width of the PyTorch Net
HPAD = 16     # lane width of the packed parameter buffer (>= HIDDEN, >= n_actions)


def _round_up(a, m):
    return -(-a // m) * m


def param_layout(n_states):
    """Row offsets (all multiples of 8 => sublane aligned) in the packed buffer."""
    n_pad = _round_up(max(int(n_states), 1), 8)
    off_w1 = 0                     # rows [0:n_states], lanes [0:HIDDEN]
    off_b1 = n_pad                 # 1 row used, 8 reserved
    off_w2 = off_b1 + 8            # rows [0:HIDDEN], lanes [0:HIDDEN]
    off_b2 = off_w2 + HPAD
    off_w3 = off_b2 + 8            # rows [0:HIDDEN], lanes [0:n_actions]
    off_b3 = off_w3 + HPAD
    total = off_b3 + 8
    return dict(off_w1=off_w1, off_b1=off_b1, off_w2=off_w2, off_b2=off_b2,
                off_w3=off_w3, off_b3=off_b3, total=total)


def _mlp_kernel(x_ref, p_ref, out_ref, *, n_states, n_actions, lay):
    """x_ref: (TB, n_states); p_ref: (total, HPAD) packed params; out_ref: (TB, n_actions)."""
    x = x_ref[...]
    w1 = p_ref[pl.ds(lay["off_w1"], n_states), :]   # (n_states, HPAD)
    b1 = p_ref[pl.ds(lay["off_b1"], 1), :]          # (1, HPAD)
    w2 = p_ref[pl.ds(lay["off_w2"], HPAD), :]       # (HPAD, HPAD); rows/cols >= HIDDEN are 0
    b2 = p_ref[pl.ds(lay["off_b2"], 1), :]
    w3 = p_ref[pl.ds(lay["off_w3"], HPAD), :]       # (HPAD, HPAD); cols [0:n_actions] used
    b3 = p_ref[pl.ds(lay["off_b3"], 1), :]

    hi = jax.lax.Precision.HIGHEST  # strict f32 matmul; compute slack makes this free
    h = jnp.maximum(jnp.dot(x, w1, preferred_element_type=jnp.float32, precision=hi) + b1, 0.0)
    h = jnp.maximum(jnp.dot(h, w2, preferred_element_type=jnp.float32, precision=hi) + b2, 0.0)
    o = jnp.dot(h, w3, preferred_element_type=jnp.float32, precision=hi) + b3
    out_ref[...] = o[:, :n_actions].astype(out_ref.dtype)


@functools.partial(jax.jit, static_argnames=("n_actions",))
def net_forward(x, packed_params, *, n_actions):
    """x: (B, n_states) f32. packed_params: (total, HPAD) f32. Returns (B, n_actions)."""
    B, n_states = x.shape
    lay = param_layout(n_states)
    assert packed_params.shape == (lay["total"], HPAD)
    assert HIDDEN <= HPAD and n_actions <= HPAD

    # Batch tiling: round B up to a multiple of 8.  Small batches -> one tile
    # (per-call overhead dominates); bigger batches -> 512-1024 row tiles for
    # HBM-roofline efficiency, keeping >=2 tiles so v7x's two TCs share work.
    B8 = _round_up(B, 8)
    if B8 < 512:
        TB = B8
    elif B8 <= 2048:
        TB = _round_up(-(-B8 // 2), 8)   # exactly two tiles
    else:
        TB = 1024
    B_pad = _round_up(B8, TB)

    x_pad = jnp.pad(x, ((0, B_pad - B), (0, 0))) if B_pad != B else x

    kernel = functools.partial(_mlp_kernel, n_states=n_states,
                               n_actions=n_actions, lay=lay)

    out = pl.pallas_call(
        kernel,
        out_shape=jax.ShapeDtypeStruct((B_pad, n_actions), jnp.float32),
        grid_spec=pltpu.PrefetchScalarGridSpec(
            num_scalar_prefetch=0,
            grid=(B_pad // TB,),
            in_specs=[
                pl.BlockSpec((TB, n_states), lambda i: (i, 0)),        # x tile, no lane pad
                pl.BlockSpec((lay["total"], HPAD), lambda i: (0, 0)),  # params, VMEM-resident
            ],
            out_specs=pl.BlockSpec((TB, n_actions), lambda i: (i, 0)),
        ),
        compiler_params=pltpu.CompilerParams(
            dimension_semantics=("parallel",),  # split batch tiles across TCs (v7x)
        ),
    )(x_pad, packed_params)

    # Padded batch rows pick up biases (garbage) -> discard them here.
    return out[:B] if B_pad != B else out


def init_params(key, n_states, n_actions):
    """Mirror the PyTorch module init: weights ~ Normal(0, 0.1); biases use the
    nn.Linear default Uniform(-1/sqrt(fan_in), 1/sqrt(fan_in)).
    Weights are stored transposed as (in, out) so the kernel computes x @ W + b."""
    ks = jax.random.split(key, 6)

    def linear(kw, kb, fan_in, fan_out):
        w = 0.1 * jax.random.normal(kw, (fan_in, fan_out), dtype=jnp.float32)
        bound = 1.0 / jnp.sqrt(float(fan_in))
        b = jax.random.uniform(kb, (1, fan_out), dtype=jnp.float32,
                               minval=-bound, maxval=bound)
        return w, b

    w1, b1 = linear(ks[0], ks[1], n_states, HIDDEN)
    w2, b2 = linear(ks[2], ks[3], HIDDEN, HIDDEN)
    w3, b3 = linear(ks[4], ks[5], HIDDEN, n_actions)
    return dict(w1=w1, b1=b1, w2=w2, b2=b2, w3=w3, b3=b3)


def pack_params(params, n_states, n_actions):
    """Pack (w1,b1,w2,b2,w3,b3) into one zero-padded (total, HPAD) f32 buffer.
    Padded rows/lanes are exactly zero, so padded contributions vanish."""
    lay = param_layout(n_states)
    p = jnp.zeros((lay["total"], HPAD), jnp.float32)
    p = p.at[lay["off_w1"]:lay["off_w1"] + n_states, :HIDDEN].set(params["w1"])
    p = p.at[lay["off_b1"], :HIDDEN].set(params["b1"].reshape(-1))
    p = p.at[lay["off_w2"]:lay["off_w2"] + HIDDEN, :HIDDEN].set(params["w2"])
    p = p.at[lay["off_b2"], :HIDDEN].set(params["b2"].reshape(-1))
    p = p.at[lay["off_w3"]:lay["off_w3"] + HIDDEN, :n_actions].set(params["w3"])
    p = p.at[lay["off_b3"], :n_actions].set(params["b3"].reshape(-1))
    return p


def reference_forward(x, params):
    hi = jax.lax.Precision.HIGHEST
    h = jnp.maximum(jnp.dot(x, params["w1"], precision=hi) + params["b1"], 0.0)
    h = jnp.maximum(jnp.dot(h, params["w2"], precision=hi) + params["b2"], 0.0)
    return jnp.dot(h, params["w3"], precision=hi) + params["b3"]


if __name__ == "__main__":
    key = jax.random.PRNGKey(0)
    k_param, k_x, k_xb = jax.random.split(key, 3)

    n_states, n_actions = 8, 4
    params = init_params(k_param, n_states, n_actions)
    packed = pack_params(params, n_states, n_actions)

    # Small case consistent with the module (batch=2): single 8-row tile.
    x = jax.random.normal(k_x, (2, n_states), dtype=jnp.float32)
    out = jax.block_until_ready(net_forward(x, packed, n_actions=n_actions))
    ref = reference_forward(x, params)
    assert out.shape == (2, n_actions)
    assert jnp.allclose(out, ref, atol=1e-5, rtol=1e-5)

    # Batched case exercising the grid (2 tiles of 256 rows, parallel on v7x).
    xb = jax.random.normal(k_xb, (512, n_states), dtype=jnp.float32)
    outb = jax.block_until_ready(net_forward(xb, packed, n_actions=n_actions))
    refb = reference_forward(xb, params)
    assert outb.shape == (512, n_actions)
    assert jnp.allclose(outb, refb, atol=1e-5, rtol=1e-5)

    print("KERNEL_OK")
</pallas_src>

<mosaic_0001>
module attributes {stable_mosaic.version = 11 : i64} {
  func.func @_mlp_kernel(%arg0: i32, %arg1: memref<8x8xf32, #tpu.memory_space<vmem>>, %arg2: memref<64x16xf32, #tpu.memory_space<vmem>>, %arg3: memref<8x4xf32, #tpu.memory_space<vmem>>) attributes {dimension_semantics = [#tpu.dimension_semantics<parallel>], iteration_bounds = array<i64: 1>, scalar_prefetch = 0 : i64, scratch_operands = 0 : i64, tpu.core_type = #tpu.core_type<tc>, window_params = [{transform_indices = @transform_0, window_bounds = array<i64: 8, 8>}, {pipeline_mode = #tpu.pipeline_mode<synchronous>, transform_indices = @transform_1, window_bounds = array<i64: 64, 16>}, {transform_indices = @transform_2, window_bounds = array<i64: 8, 4>}]} {
    %c0 = arith.constant 0 : index
    %c0_0 = arith.constant 0 : index
    %0 = vector.load %arg1[%c0, %c0_0] : memref<8x8xf32, #tpu.memory_space<vmem>>, vector<8x8xf32>
    %c0_1 = arith.constant 0 : index
    %c0_2 = arith.constant 0 : index
    %1 = vector.load %arg2[%c0_1, %c0_2] : memref<64x16xf32, #tpu.memory_space<vmem>>, vector<8x16xf32>
    %c8 = arith.constant 8 : index
    %c0_3 = arith.constant 0 : index
    %2 = vector.load %arg2[%c8, %c0_3] : memref<64x16xf32, #tpu.memory_space<vmem>>, vector<1x16xf32>
    %c16 = arith.constant 16 : index
    %c0_4 = arith.constant 0 : index
    %3 = vector.load %arg2[%c16, %c0_4] : memref<64x16xf32, #tpu.memory_space<vmem>>, vector<16x16xf32>
    %c32 = arith.constant 32 : index
    %c0_5 = arith.constant 0 : index
    %4 = vector.load %arg2[%c32, %c0_5] : memref<64x16xf32, #tpu.memory_space<vmem>>, vector<1x16xf32>
    %c40 = arith.constant 40 : index
    %c0_6 = arith.constant 0 : index
    %5 = vector.load %arg2[%c40, %c0_6] : memref<64x16xf32, #tpu.memory_space<vmem>>, vector<16x16xf32>
    %c56 = arith.constant 56 : index
    %c0_7 = arith.constant 0 : index
    %6 = vector.load %arg2[%c56, %c0_7] : memref<64x16xf32, #tpu.memory_space<vmem>>, vector<1x16xf32>
    %cst = arith.constant dense<0.000000e+00> : vector<8x16xf32>
    %7 = tpu.matmul %0, %1, %cst {dimension_numbers = #tpu.dot_dimension_numbers<[1], [0], [0], [1], [0, 0, 1, 1], [], []>, precision = #tpu.contract_precision<fp32>} : vector<8x8xf32>, vector<8x16xf32>, vector<8x16xf32> -> vector<8x16xf32>
    %8 = vector.broadcast %2 : vector<1x16xf32> to vector<8x16xf32>
    %9 = arith.addf %7, %8 : vector<8x16xf32>
    %cst_8 = arith.constant 0.000000e+00 : f32
    %10 = vector.broadcast %cst_8 : f32 to vector<8x16xf32>
    %11 = arith.maximumf %9, %10 : vector<8x16xf32>
    %cst_9 = arith.constant dense<0.000000e+00> : vector<8x16xf32>
    %12 = tpu.matmul %11, %3, %cst_9 {dimension_numbers = #tpu.dot_dimension_numbers<[1], [0], [0], [1], [0, 0, 1, 1], [], []>, precision = #tpu.contract_precision<fp32>} : vector<8x16xf32>, vector<16x16xf32>, vector<8x16xf32> -> vector<8x16xf32>
    %13 = vector.broadcast %4 : vector<1x16xf32> to vector<8x16xf32>
    %14 = arith.addf %12, %13 : vector<8x16xf32>
    %cst_10 = arith.constant 0.000000e+00 : f32
    %15 = vector.broadcast %cst_10 : f32 to vector<8x16xf32>
    %16 = arith.maximumf %14, %15 : vector<8x16xf32>
    %cst_11 = arith.constant dense<0.000000e+00> : vector<8x16xf32>
    %17 = tpu.matmul %16, %5, %cst_11 {dimension_numbers = #tpu.dot_dimension_numbers<[1], [0], [0], [1], [0, 0, 1, 1], [], []>, precision = #tpu.contract_precision<fp32>} : vector<8x16xf32>, vector<16x16xf32>, vector<8x16xf32> -> vector<8x16xf32>
    %18 = vector.broadcast %6 : vector<1x16xf32> to vector<8x16xf32>
    %19 = arith.addf %17, %18 : vector<8x16xf32>
    %20 = vector.extract_strided_slice %19 {offsets = [0, 0], sizes = [8, 4], strides = [1, 1]} : vector<8x16xf32> to vector<8x4xf32>
    %c0_12 = arith.constant 0 : index
    %c0_13 = arith.constant 0 : index
    %21 = vector.load %arg3[%c0_12, %c0_13] : memref<8x4xf32, #tpu.memory_space<vmem>>, vector<8x4xf32>
    tpu.vector_store %arg3[%c0_12, %c0_13], %20 {strides = array<i32>} : memref<8x4xf32, #tpu.memory_space<vmem>>, vector<8x4xf32>,
    return
  }
  func.func @transform_0(%arg0: i32) -> (i32, i32) {
    %c0_i32 = arith.constant 0 : i32
    %c0_i32_0 = arith.constant 0 : i32
    return %arg0, %c0_i32 : i32, i32
  }
  func.func @transform_1(%arg0: i32) -> (i32, i32) {
    %c0_i32 = arith.constant 0 : i32
    %c0_i32_0 = arith.constant 0 : i32
    %c0_i32_1 = arith.constant 0 : i32
    return %c0_i32, %c0_i32_0 : i32, i32
  }
  func.func @transform_2(%arg0: i32) -> (i32, i32) {
    %c0_i32 = arith.constant 0 : i32
    %c0_i32_0 = arith.constant 0 : i32
    return %arg0, %c0_i32 : i32, i32
  }
}

</mosaic_0001>

<bundles_post_ra>
// kernel: net_forward.1
= control target key start
LH: loop header
LB: loop body
LE: loop exit
PB: predicated region body
PF: predicated region fallthrough
CT: control target
= control target key end

     0   :  { %vm24_vm0 = vcmask 64512   ;;  %v1651_v0 = vmov 0.0   ;;  %vm1652_vm1 = vmmov 0   ;;  %v1653_v16 = vmov 0.0|0.0   ;;  %s1755_s1 = inlined_call_operand.vmem [shape: f32[64,16], index: 1, kind: input, shape index: {}]   ;;  %s1756_s0 = inlined_call_operand.vmem [shape: f32[8,8], index: 0, kind: input, shape index: {}]   ;;  %s1757_s2 = inlined_call_operand.vmem [shape: f32[8,4], index: 2, kind: output, shape index: {}]  }
   0x1   :  { %1481 = vmatprep.subr.mxu0 %v1651_v0  ;;  %v12_v1 = vld [vmem:[%s1755_s1] sm:$0xff]  ;;  %1483 = vmatprep.mubr.msk.f32.mxu0 %vm1652_vm1, %v1651_v0  ;;  %v14_v14 = vld [vmem:[%s1755_s1 + $0x10] sm:$0xff]  ;;  %v15_v15 = vld [vmem:[%s1755_s1 + $0x18] sm:$0xff]  ;;  %vm479_vm2 = vcmask 130048   ;;  %vm1409_vm3 = vcmask 31744  }
   0x2   :  { %v11_v2 = vld [vmem:[%s1756_s0] sm:$0xff]  ;;  %v29_v3 = vand.u32 4294901760, %v12_v1  ;;  %1466 = vmatprep.subr.mxu1 %v1651_v0  ;;  %1468 = vmatprep.mubr.msk.f32.mxu1 %vm1652_vm1, %v1651_v0  ;;  %v484_v17 = vand.u32 4294901760, %v14_v14  ;;  %v487_v18 = vand.u32 4294901760, %v15_v15  ;;  %v1415_v33 = vld [vmem:[%s1755_s1 + $0x8] ss:$0 sm:$0xff] }
   0x3   :  { %v26_v4 = vsel %vm24_vm0, %v11_v2, 0  ;;  %v17_v45 = vld [vmem:[%s1755_s1 + $0x28] sm:$0xff]  ;;  %v18_v46 = vld [vmem:[%s1755_s1 + $0x30] sm:$0xff]  ;;  %v1416_v61 = vld [vmem:[%s1755_s1 + $0x20] ss:$0 sm:$0xff] }
   0x4   :  { %v94_v5 = vand.u32 4294901760, %v26_v4  ;;  %v106_v6 = vsub.f32 %v12_v1, %v29_v3  ;;  %1482 = vmatpush3.msra.mxu0 %v29_v3  ;;  %1467 = vmatpush3.msra.mxu1 %v29_v3  ;;  %v1581_v19 = vpack.c.bf16 %v487_v18, %v484_v17  ;;  %v562_v20 = vsub.f32 %v14_v14, %v484_v17 }
   0x5   :  { %1471 = vmatprep.subr.mxu1 %v1651_v0  ;;  %1486 = vmatprep.subr.mxu0 %v1651_v0  ;;  %v569_v21 = vsub.f32 %v15_v15, %v487_v18  ;;  %v951_v47 = vand.u32 4294901760, %v17_v45  ;;  %v954_v48 = vand.u32 4294901760, %v18_v46 }
   0x6   :  { %v95_v7 = vsub.f32 %v26_v4, %v94_v5  ;;  %v107_v8 = vand.u32 4294901760, %v106_v6  ;;  %v563_v22 = vand.u32 4294901760, %v562_v20 }
   0x7   :  { %v570_v23 = vand.u32 4294901760, %v569_v21  ;;  %v1587_v29 = vpack.c.bf16 %v569_v21, %v562_v20  ;;  %v1599_v49 = vpack.c.bf16 %v954_v48, %v951_v47  ;;  %v1029_v50 = vsub.f32 %v17_v45, %v951_v47 }
   0x8   :  { %v96_v9 = vand.u32 4294901760, %v95_v7  ;;  %v108_v10 = vsub.f32 %v106_v6, %v107_v8  ;;  %v564_v24 = vsub.f32 %v562_v20, %v563_v22  ;;  %v1036_v51 = vsub.f32 %v18_v46, %v954_v48 }
   0x9   :  { %v571_v25 = vsub.f32 %v569_v21, %v570_v23  ;;  %v1593_v30 = vpack.c.bf16 %v570_v23, %v563_v22  ;;  %v1030_v52 = vand.u32 4294901760, %v1029_v50 }
   0xa   :  { %1484 = vmatmul.mubr.f32.vlgmr.msra.gmra.mrb[0].mxu0 %v96_v9  ;;  %v97_v11 = vsub.f32 %v95_v7, %v96_v9  ;;  %v109_v12 = vand.u32 4294901760, %v108_v10  ;;  %v565_v26 = vand.u32 4294901760, %v564_v24  ;;  %v1037_v53 = vand.u32 4294901760, %v1036_v51  ;;  %v1417_v9 = vld [vmem:[%s1755_s1 + $0x38] ss:$0 sm:$0xff] }
   0xb   :  { %1487 = vmatpush3.msra.mxu0 %v107_v8  ;;  %1488 = vmatprep.mubr.msk.f32.mxu0 %vm1652_vm1, %v1651_v0  ;;  %v572_v27 = vand.u32 4294901760, %v571_v25  ;;  %v1031_v54 = vsub.f32 %v1029_v50, %v1030_v52  ;;  %v1605_v59 = vpack.c.bf16 %v1036_v51, %v1029_v50 }
   0xc   :  { %v98_v13 = vand.u32 4294901760, %v97_v11  ;;  %1491 = vmatprep.subr.mxu0 %v1651_v0  ;;  %v1038_v55 = vsub.f32 %v1036_v51, %v1037_v53  ;;  %v1611_v60 = vpack.c.bf16 %v1037_v53, %v1030_v52 }
   0xd   :  { %v1584_v28 = vpack.c.bf16 %v572_v27, %v565_v26  ;;  %v1032_v56 = vand.u32 4294901760, %v1031_v54 }
   0xe   :  { %1469 = vmatmul.mubr.f32.vlgmr.msra.gmra.mrb[0].mxu1 %v98_v13  ;;  %v1039_v57 = vand.u32 4294901760, %v1038_v55 }
   0xf   :  { %1472 = vmatpush3.msra.mxu1 %v109_v12  ;;  %1473 = vmatprep.mubr.msk.f32.mxu1 %vm1652_vm1, %v1651_v0 }
  0x10   :  { %1476 = vmatprep.subr.mxu1 %v1651_v0  ;;  %v1602_v58 = vpack.c.bf16 %v1039_v57, %v1032_v56 }
  0x12   :  { %1489 = vmatmul.mubr.f32.vlgmr.msra.gmra.mrb[0].mxu0 %v94_v5 }
  0x13   :  { %1492 = vmatpush3.msra.mxu0 %v29_v3  ;;  %1493 = vmatprep.mubr.msk.f32.mxu0 %vm1652_vm1, %v1651_v0 }
  0x14   :  { %1598 = vmatprep.subr.bf16.mxu0 %v1653_v16 }
  0x16   :  { %1474 = vmatmul.mubr.f32.vlgmr.msra.gmra.mrb[0].mxu1 %v94_v5 }
  0x17   :  { %1477 = vmatpush3.msra.mxu1 %v106_v6  ;;  %1478 = vmatprep.mubr.msk.f32.mxu1 %vm1652_vm1, %v1651_v0 }
  0x18   :  { %1580 = vmatprep.subr.bf16.mxu1 %v1653_v16 }
  0x1a   :  { %1494 = vmatmul.mubr.f32.vlgmr.msra.gmra.mrb[0].mxu0 %v94_v5 }
  0x1b   :  { %1542 = vmatprep.mubr.msk.f32.mxu0 %vm1652_vm1, %v1651_v0  ;;  %1600 = vmatpush3.bf16.msra.mxu0 %v1599_v49 }
  0x1c   :  { %1601 = vmatprep.subr.bf16.mxu0 %v1653_v16 }
  0x1e   :  { %1479 = vmatmul.mubr.f32.vlgmr.msra.gmra.mrb[0].mxu1 %v95_v7 }
  0x1f   :  { %1500 = vmatprep.mubr.msk.f32.mxu1 %vm1652_vm1, %v1651_v0  ;;  %1582 = vmatpush3.bf16.msra.mxu1 %v1581_v19 }
  0x20   :  { %1583 = vmatprep.subr.bf16.mxu1 %v1653_v16 }
  0xed   :  { %v470_v31 = vpop.f32.mrb[0].mxu0 }
  0xee   :  { %v1495_v32 = vpop.f32.mrb[1].mxu0 }
  0xf1   :  { %v250_v34 = vpop.f32.mrb[0].mxu1 }
  0xf2   :  { %v1616_v35 = vadd.f32 %v1415_v33, %v250_v34  ;;  %v1480_v36 = vpop.f32.mrb[1].mxu1 }
  0xf4   :  { %v1617_v37 = vadd.f32 %v1616_v35, %v470_v31 }
  0xf6   :  { %v474_v38 = vmax.f32 %v1617_v37, 0.0 }
  0xf8   :  { %v481_v39 = vsel %vm479_vm2, %v474_v38, 0 }
  0xf9   :  { %v550_v40 = vand.u32 4294901760, %v481_v39 }
  0xfb   :  { %v551_v41 = vsub.f32 %v481_v39, %v550_v40 }
  0xfd   :  { %v552_v42 = vand.u32 4294901760, %v551_v41 }
  0xff   :  { %v553_v43 = vsub.f32 %v551_v41, %v552_v42 }
 0x101   :  { %v554_v44 = vand.u32 4294901760, %v553_v43 }
 0x103   :  { %1501 = vmatmul.mubr.f32.vlgmr.msra.gmra.mrb[2].mxu1 %v554_v44 }
 0x104   :  { %1585 = vmatpush3.bf16.msra.mxu1 %v1584_v28  ;;  %1507 = vmatprep.mubr.msk.f32.mxu1 %vm1652_vm1, %v1651_v0 }
 0x105   :  { %1586 = vmatprep.subr.bf16.mxu1 %v1653_v16 }
 0x10b   :  { %1508 = vmatmul.mubr.f32.vlgmr.msra.gmra.mrb[2].mxu1 %v550_v40 }
 0x10c   :  { %1588 = vmatpush3.bf16.msra.mxu1 %v1587_v29  ;;  %1514 = vmatprep.mubr.msk.f32.mxu1 %vm1652_vm1, %v1651_v0 }
 0x10d   :  { %1589 = vmatprep.subr.bf16.mxu1 %v1653_v16 }
 0x113   :  { %1515 = vmatmul.mubr.f32.vlgmr.msra.gmra.mrb[2].mxu1 %v551_v41 }
 0x114   :  { %1591 = vmatpush3.bf16.msra.mxu1 %v1581_v19  ;;  %1521 = vmatprep.mubr.msk.f32.mxu1 %vm1652_vm1, %v1651_v0 }
 0x115   :  { %1592 = vmatprep.subr.bf16.mxu1 %v1653_v16 }
 0x11b   :  { %1522 = vmatmul.mubr.f32.vlgmr.msra.gmra.mrb[2].mxu1 %v552_v42 }
 0x11c   :  { %1594 = vmatpush3.bf16.msra.mxu1 %v1593_v30  ;;  %1528 = vmatprep.mubr.msk.f32.mxu1 %vm1652_vm1, %v1651_v0 }
 0x11d   :  { %1595 = vmatprep.subr.bf16.mxu1 %v1653_v16 }
 0x123   :  { %1529 = vmatmul.mubr.f32.vlgmr.msra.gmra.mrb[2].mxu1 %v550_v40 }
 0x124   :  { %1597 = vmatpush3.bf16.msra.mxu1 %v1581_v19  ;;  %1535 = vmatprep.mubr.msk.f32.mxu1 %vm1652_vm1, %v1651_v0 }
 0x12b   :  { %1536 = vmatmul.mubr.f32.vlgmr.msra.gmra.mrb[2].mxu1 %v550_v40 }
 0x1fe   :  { %v938_v62 = vpop.f32.mrb[2].mxu1 }
 0x1ff   :  { %v1618_v63 = vadd.f32 %v1416_v61, %v938_v62  ;;  %v1537_v1 = vpop.f32.mrb[3].mxu1 }
 0x201   :  { %v942_v2 = vmax.f32 %v1618_v63, 0.0 }
 0x203   :  { %v948_v3 = vsel %vm479_vm2, %v942_v2, 0 }
 0x204   :  { %v1017_v4 = vand.u32 4294901760, %v948_v3 }
 0x206   :  { %v1018_v5 = vsub.f32 %v948_v3, %v1017_v4 }
 0x208   :  { %v1019_v6 = vand.u32 4294901760, %v1018_v5 }
 0x20a   :  { %v1020_v7 = vsub.f32 %v1018_v5, %v1019_v6 }
 0x20c   :  { %v1021_v8 = vand.u32 4294901760, %v1020_v7 }
 0x20e   :  { %1543 = vmatmul.mubr.f32.vlgmr.msra.gmra.mrb[2].mxu0 %v1021_v8 }
 0x20f   :  { %1603 = vmatpush3.bf16.msra.mxu0 %v1602_v58  ;;  %1549 = vmatprep.mubr.msk.f32.mxu0 %vm1652_vm1, %v1651_v0 }
 0x210   :  { %1604 = vmatprep.subr.bf16.mxu0 %v1653_v16 }
 0x216   :  { %1550 = vmatmul.mubr.f32.vlgmr.msra.gmra.mrb[2].mxu0 %v1017_v4 }
 0x217   :  { %1606 = vmatpush3.bf16.msra.mxu0 %v1605_v59  ;;  %1556 = vmatprep.mubr.msk.f32.mxu0 %vm1652_vm1, %v1651_v0 }
 0x218   :  { %1607 = vmatprep.subr.bf16.mxu0 %v1653_v16 }
 0x21e   :  { %1557 = vmatmul.mubr.f32.vlgmr.msra.gmra.mrb[2].mxu0 %v1018_v5 }
 0x21f   :  { %1609 = vmatpush3.bf16.msra.mxu0 %v1599_v49  ;;  %1563 = vmatprep.mubr.msk.f32.mxu0 %vm1652_vm1, %v1651_v0 }
 0x220   :  { %1610 = vmatprep.subr.bf16.mxu0 %v1653_v16 }
 0x226   :  { %1564 = vmatmul.mubr.f32.vlgmr.msra.gmra.mrb[2].mxu0 %v1019_v6 }
 0x227   :  { %1612 = vmatpush3.bf16.msra.mxu0 %v1611_v60  ;;  %1570 = vmatprep.mubr.msk.f32.mxu0 %vm1652_vm1, %v1651_v0 }
 0x228   :  { %1613 = vmatprep.subr.bf16.mxu0 %v1653_v16 }
 0x22e   :  { %1571 = vmatmul.mubr.f32.vlgmr.msra.gmra.mrb[2].mxu0 %v1017_v4 }
 0x22f   :  { %1615 = vmatpush3.bf16.msra.mxu0 %v1599_v49  ;;  %1577 = vmatprep.mubr.msk.f32.mxu0 %vm1652_vm1, %v1651_v0 }
 0x236   :  { %1578 = vmatmul.mubr.f32.vlgmr.msra.gmra.mrb[2].mxu0 %v1017_v4 }
 0x309   :  { %v1405_v10 = vpop.f32.mrb[2].mxu0 }
 0x30a   :  { %v1619_v11 = vadd.f32 %v1417_v9, %v1405_v10  ;;  %v1579_v12 = vpop.f32.mrb[3].mxu0 }
 0x30c   :  { %1410 = vst.msk [vmem:[%s1757_s2] sm:$0xff] %vm1409_vm3, %v1619_v11 }

</bundles_post_ra>
